<compile_context>
chip_gen: v6e
topology: v6e:2x2x1
jax: 0.10.0
libtpu: 0.0.40
codegen_flags: <defaults>
</compile_context>

<pallas_src>
import functools

import jax
import jax.numpy as jnp
from jax.experimental import pallas as pl
from jax.experimental.pallas import tpu as pltpu


_MAX_TILE_L = 512                    # output-length tile for long sequences
_VMEM_LIMIT = 48 * 1024 * 1024       # explicit scoped-VMEM budget (v5e/v6e/v7x safe)


def _pointwise_kernel(x_ref, w_ref, b_ref, out_ref):
    """kernel_size == 1: one MXU matmul per (batch, L-tile)."""
    # x_ref: (C_in, TL), w_ref: (C_out, C_in), b_ref: (C_out, 1), out_ref: (C_out, TL)
    acc = jax.lax.dot_general(
        w_ref[...], x_ref[...],
        dimension_numbers=(((1,), (0,)), ((), ())),
        preferred_element_type=jnp.float32)
    acc = acc + b_ref[...].astype(jnp.float32)
    out_ref[...] = acc.astype(out_ref.dtype)


def _conv1d_kernel(xt_ref, w_ref, b_ref, out_ref, *, K, stride, dilation, TL, span):
    """General K: sum of K shifted matmuls on a VMEM-resident (L, C_in) input."""
    # xt_ref: (L_tot, C_in)  resident across all L-tiles of this batch element
    # w_ref : (K, C_out, C_in)   b_ref: (C_out, 1)   out_ref: (C_out, TL)
    j = pl.program_id(1)
    start = pl.multiple_of(j * (TL * stride), TL * stride)
    chunk = xt_ref[pl.ds(start, span), :]            # aligned dynamic sublane slice

    acc = None
    for k in range(K):                               # K is small & static -> unrolled
        lo = k * dilation
        hi = lo + (TL - 1) * stride + 1
        if stride == 1:
            x_k = chunk[lo:hi, :]                    # (TL, C_in) static slice
        else:
            # TODO(synk): stride > 1 uses a static strided row slice; untuned.
            x_k = jax.lax.slice(chunk, (lo, 0), (hi, chunk.shape[1]), (stride, 1))
        contrib = jax.lax.dot_general(
            w_ref[k], x_k,
            dimension_numbers=(((1,), (1,)), ((), ())),   # contract C_in, no transposes
            preferred_element_type=jnp.float32)           # -> (C_out, TL)
        acc = contrib if acc is None else acc + contrib

    acc = acc + b_ref[...].astype(jnp.float32)
    out_ref[...] = acc.astype(out_ref.dtype)


def conv_norm_forward(signal, weight, bias=None, *, stride=1, padding=None, dilation=1):
    """Forward pass of ConvNorm (nn.Conv1d) as a Pallas TPU kernel."""
    B, C_in, L = signal.shape
    C_out, C_in_w, K = weight.shape
    assert C_in_w == C_in, "weight / input channel mismatch"
    if padding is None:
        assert K % 2 == 1
        padding = (dilation * (K - 1)) // 2

    L_out = (L + 2 * padding - dilation * (K - 1) - 1) // stride + 1
    assert L_out > 0

    TL = L_out if L_out <= _MAX_TILE_L else _MAX_TILE_L
    num_tiles = int(pl.cdiv(L_out, TL))
    L_out_pad = num_tiles * TL

    if bias is None:
        b2d = jnp.zeros((C_out, 1), dtype=jnp.float32)
    else:
        b2d = bias.reshape(C_out, 1).astype(jnp.float32)

    out_dtype = signal.dtype
    itemsize = jnp.dtype(signal.dtype).itemsize
    compiler_params = pltpu.CompilerParams(
        dimension_semantics=("parallel", "parallel"),
        vmem_limit_bytes=_VMEM_LIMIT)

    if K == 1:
        # Pointwise conv: pure matmul; no halo, no transposes, no dynamic slicing.
        x_p = jnp.pad(signal, ((0, 0), (0, 0), (padding, padding)))
        if stride != 1:
            x_p = x_p[:, :, ::stride]
        Ls = x_p.shape[2]
        if Ls < L_out_pad:
            x_p = jnp.pad(x_p, ((0, 0), (0, 0), (0, L_out_pad - Ls)))
        elif Ls > L_out_pad:
            x_p = x_p[:, :, :L_out_pad]
        w2d = weight[:, :, 0]                       # (C_out, C_in), native dtype -> MXU

        out = pl.pallas_call(
            _pointwise_kernel,
            out_shape=jax.ShapeDtypeStruct((B, C_out, L_out_pad), out_dtype),
            grid_spec=pltpu.PrefetchScalarGridSpec(
                num_scalar_prefetch=0,
                grid=(B, num_tiles),
                in_specs=[
                    pl.BlockSpec((pl.Squeezed(), C_in, TL), lambda b, j: (b, 0, j)),
                    pl.BlockSpec((C_out, C_in), lambda b, j: (0, 0)),
                    pl.BlockSpec((C_out, 1), lambda b, j: (0, 0)),
                ],
                out_specs=pl.BlockSpec((pl.Squeezed(), C_out, TL),
                                       lambda b, j: (b, 0, j)),
            ),
            compiler_params=compiler_params,
            cost_estimate=pl.CostEstimate(
                flops=2 * B * C_out * C_in * L_out_pad,
                transcendentals=0,
                bytes_accessed=(B * C_in * L_out_pad * itemsize
                                + C_out * C_in * itemsize + C_out * 4
                                + B * C_out * L_out_pad * itemsize)),
        )(x_p, w2d, b2d)
    else:
        # General K: padded input kept VMEM-resident per batch in (L, C_in) layout.
        chunk_span = (TL - 1) * stride + dilation * (K - 1) + 1
        span = ((chunk_span + 7) // 8) * 8          # round up to sublane multiple
        L_tot = max(L + 2 * padding, (num_tiles - 1) * TL * stride + span)
        x_p = jnp.pad(signal, ((0, 0), (0, 0), (padding, L_tot - L - padding)))
        xt = jnp.transpose(x_p, (0, 2, 1))          # (B, L_tot, C_in)
        w_t = jnp.transpose(weight, (2, 0, 1))      # (K, C_out, C_in)
        # TODO(synk): for extremely long sequences (L*C_in*4B >> 16 MiB) the
        # resident input would need an overlapping-window (halo) input pipeline.

        kernel = functools.partial(_conv1d_kernel, K=K, stride=stride,
                                   dilation=dilation, TL=TL, span=span)
        out = pl.pallas_call(
            kernel,
            out_shape=jax.ShapeDtypeStruct((B, C_out, L_out_pad), out_dtype),
            grid_spec=pltpu.PrefetchScalarGridSpec(
                num_scalar_prefetch=0,
                grid=(B, num_tiles),
                in_specs=[
                    pl.BlockSpec((pl.Squeezed(), L_tot, C_in), lambda b, j: (b, 0, 0)),
                    pl.BlockSpec((K, C_out, C_in), lambda b, j: (0, 0, 0)),
                    pl.BlockSpec((C_out, 1), lambda b, j: (0, 0)),
                ],
                out_specs=pl.BlockSpec((pl.Squeezed(), C_out, TL),
                                       lambda b, j: (b, 0, j)),
            ),
            compiler_params=compiler_params,
            cost_estimate=pl.CostEstimate(
                flops=2 * B * C_out * C_in * K * L_out_pad,
                transcendentals=0,
                bytes_accessed=(B * L_tot * C_in * itemsize
                                + K * C_out * C_in * itemsize + C_out * 4
                                + B * C_out * L_out_pad * itemsize)),
        )(xt, w_t, b2d)

    if L_out_pad != L_out:
        out = out[:, :, :L_out]
    return out


class ConvNorm:
    """Pallas/JAX port of the PyTorch ConvNorm module (1D convolution)."""

    def __init__(self, key, in_channels, out_channels, kernel_size=1, stride=1,
                 padding=None, dilation=1, bias=True, dtype=jnp.float32):
        if padding is None:
            assert kernel_size % 2 == 1
            padding = (dilation * (kernel_size - 1)) // 2
        self.stride, self.padding, self.dilation = stride, padding, dilation
        kw, kb = jax.random.split(key)
        scale = 1.0 / float(in_channels * kernel_size) ** 0.5
        self.weight = scale * jax.random.normal(
            kw, (out_channels, in_channels, kernel_size), dtype)
        self.bias = (scale * jax.random.normal(kb, (out_channels,), dtype)
                     if bias else None)

    def __call__(self, signal):
        return conv_norm_forward(signal, self.weight, self.bias,
                                 stride=self.stride, padding=self.padding,
                                 dilation=self.dilation)


def _reference_conv1d(signal, weight, bias, stride, padding, dilation):
    out = jax.lax.conv_general_dilated(
        signal, weight,
        window_strides=(stride,),
        padding=[(padding, padding)],
        rhs_dilation=(dilation,),
        dimension_numbers=("NCH", "OIH", "NCH"))
    if bias is not None:
        out = out + bias[None, :, None]
    return out


if __name__ == "__main__":
    root = jax.random.PRNGKey(0)

    def run_case(key, B, C_in, C_out, L, K, stride=1, dilation=1, use_bias=True):
        padding = (dilation * (K - 1)) // 2
        kx, kw, kb = jax.random.split(key, 3)
        x = jax.random.normal(kx, (B, C_in, L), dtype=jnp.float32)
        w = 0.2 * jax.random.normal(kw, (C_out, C_in, K), dtype=jnp.float32)
        b = (0.2 * jax.random.normal(kb, (C_out,), dtype=jnp.float32)
             if use_bias else None)
        out = conv_norm_forward(x, w, b, stride=stride, padding=padding,
                                dilation=dilation)
        out = jax.block_until_ready(out)
        ref = _reference_conv1d(x, w, b, stride, padding, dilation)
        assert out.shape == ref.shape, (out.shape, ref.shape)
        err = float(jnp.max(jnp.abs(out - ref)))
        assert jnp.allclose(out, ref, atol=1e-3, rtol=1e-3), err

    keys = jax.random.split(root, 4)
    # A) ConvNorm defaults: kernel_size=1 (pointwise matmul path), single L-tile.
    run_case(keys[0], B=2, C_in=32, C_out=48, L=40, K=1)
    # B) kernel_size=3 (auto padding=1), single L-tile, general path.
    run_case(keys[1], B=2, C_in=8, C_out=16, L=64, K=3)
    # C) kernel_size=5, dilation=2 (auto padding=4), multi L-tile path (TL=512).
    run_case(keys[2], B=2, C_in=16, C_out=24, L=700, K=5, dilation=2)
    # D) pointwise, multi L-tile, no bias.
    run_case(keys[3], B=1, C_in=16, C_out=16, L=1100, K=1, use_bias=False)

    print("KERNEL_OK")
</pallas_src>

<mosaic_0001>
module attributes {stable_mosaic.version = 11 : i64} {
  func.func @_pointwise_kernel(%arg0: i32, %arg1: i32, %arg2: memref<1x32x40xf32, #tpu.memory_space<vmem>>, %arg3: memref<48x32xf32, #tpu.memory_space<vmem>>, %arg4: memref<48x1xf32, #tpu.memory_space<vmem>>, %arg5: memref<1x48x40xf32, #tpu.memory_space<vmem>>) attributes {dimension_semantics = [#tpu.dimension_semantics<parallel>, #tpu.dimension_semantics<parallel>], iteration_bounds = array<i64: 2, 1>, scalar_prefetch = 0 : i64, scratch_operands = 0 : i64, tpu.core_type = #tpu.core_type<tc>, window_params = [{transform_indices = @transform_0, window_bounds = array<i64: 1, 32, 40>}, {pipeline_mode = #tpu.pipeline_mode<synchronous>, transform_indices = @transform_1, window_bounds = array<i64: 48, 32>}, {pipeline_mode = #tpu.pipeline_mode<synchronous>, transform_indices = @transform_2, window_bounds = array<i64: 48, 1>}, {transform_indices = @transform_3, window_bounds = array<i64: 1, 48, 40>}]} {
    %c0 = arith.constant 0 : index
    %c0_0 = arith.constant 0 : index
    %0 = vector.load %arg3[%c0, %c0_0] : memref<48x32xf32, #tpu.memory_space<vmem>>, vector<48x32xf32>
    %c0_1 = arith.constant 0 : index
    %c0_2 = arith.constant 0 : index
    %c0_3 = arith.constant 0 : index
    %1 = vector.load %arg2[%c0_1, %c0_2, %c0_3] : memref<1x32x40xf32, #tpu.memory_space<vmem>>, vector<1x32x40xf32>
    %2 = vector.shape_cast %1 : vector<1x32x40xf32> to vector<32x40xf32>
    %cst = arith.constant dense<0.000000e+00> : vector<48x40xf32>
    %3 = tpu.matmul %0, %2, %cst {dimension_numbers = #tpu.dot_dimension_numbers<[1], [0], [0], [1], [0, 0, 1, 1], [], []>} : vector<48x32xf32>, vector<32x40xf32>, vector<48x40xf32> -> vector<48x40xf32>
    %c0_4 = arith.constant 0 : index
    %c0_5 = arith.constant 0 : index
    %4 = vector.load %arg4[%c0_4, %c0_5] : memref<48x1xf32, #tpu.memory_space<vmem>>, vector<48x1xf32>
    %5 = vector.broadcast %4 : vector<48x1xf32> to vector<48x40xf32>
    %6 = arith.addf %3, %5 : vector<48x40xf32>
    %c0_6 = arith.constant 0 : index
    %c0_7 = arith.constant 0 : index
    %c0_8 = arith.constant 0 : index
    %7 = vector.load %arg5[%c0_6, %c0_7, %c0_8] : memref<1x48x40xf32, #tpu.memory_space<vmem>>, vector<1x48x40xf32>
    %8 = vector.shape_cast %7 : vector<1x48x40xf32> to vector<48x40xf32>
    %9 = vector.shape_cast %6 : vector<48x40xf32> to vector<1x48x40xf32>
    tpu.vector_store %arg5[%c0_6, %c0_7, %c0_8], %9 {strides = array<i32>} : memref<1x48x40xf32, #tpu.memory_space<vmem>>, vector<1x48x40xf32>,
    return
  }
  func.func @transform_0(%arg0: i32, %arg1: i32) -> (i32, i32, i32) {
    %c0_i32 = arith.constant 0 : i32
    %c0_i32_0 = arith.constant 0 : i32
    return %arg0, %c0_i32, %arg1 : i32, i32, i32
  }
  func.func @transform_1(%arg0: i32, %arg1: i32) -> (i32, i32) {
    %c0_i32 = arith.constant 0 : i32
    %c0_i32_0 = arith.constant 0 : i32
    %c0_i32_1 = arith.constant 0 : i32
    return %c0_i32, %c0_i32_0 : i32, i32
  }
  func.func @transform_2(%arg0: i32, %arg1: i32) -> (i32, i32) {
    %c0_i32 = arith.constant 0 : i32
    %c0_i32_0 = arith.constant 0 : i32
    %c0_i32_1 = arith.constant 0 : i32
    return %c0_i32, %c0_i32_0 : i32, i32
  }
  func.func @transform_3(%arg0: i32, %arg1: i32) -> (i32, i32, i32) {
    %c0_i32 = arith.constant 0 : i32
    %c0_i32_0 = arith.constant 0 : i32
    return %arg0, %c0_i32, %arg1 : i32, i32, i32
  }
}

</mosaic_0001>

<bundles_post_ra>
// kernel: tpu_custom_call.1
= control target key start
LH: loop header
LB: loop body
LE: loop exit
PB: predicated region body
PF: predicated region fallthrough
CT: control target
= control target key end

     0   :  { %s577_s12 = smov 0   ;;  %s579_s13 = smov 0   ;;  %s662_s0 = inlined_call_operand.vmem [shape: f32[2,32,40], index: 0, kind: input, shape index: {}]   ;;  %s663_s1 = inlined_call_operand.vmem [shape: f32[48,32], index: 1, kind: input, shape index: {}]   ;;  %s664_s2 = inlined_call_operand.vmem [shape: f32[48,1], index: 2, kind: input, shape index: {}]   ;;  %s665_s3 = inlined_call_operand.vmem [shape: f32[2,48,40], index: 3, kind: output, shape index: {}]  }
   0x1   :  { %s581_s14 = smov 0  }
   0x2 LB: > { %s25_s15 = sadd.s32 1, %s550_s13  ;;  %p456_p0 = scmp.ge.s32.totalorder %s554_s14, 1  ;;  %s554_s14 = sphi %s581_s14, %s13_s14   ;;  %s550_s13 = sphi %s579_s13, %s667_s13   ;;  %s546_s12 = sphi %s577_s12, %s666_s12  }
   0x3   : > { %p27_p1 = scmp.ge.s32.totalorder %s25_s15, 2  ;;  %p156_p2 = scmp.lt.s32.totalorder %s554_s14, 3 }
   0x5   : > { %s669_s15 = smov (%p27_p1, %s25_s15), 0  ;;  %p157_p3 = pnand %p456_p0, %p156_p2 }
   0x6   : > { %p186_p4 = scmp.lt.s32.totalorder (!%p157_p3), %s546_s12, 1 }
   0x7   : > { %160 = sbr.rel (%p157_p3) target bundleno = 226 (0xe2), region = 32 }
   0xc   : > { %v202_v0 = vld [vmem:[%s663_s1] sm:$0xff]  ;;  %vm248_vm0 = vcmask 261120   ;;  %v204_v1 = vld [vmem:[%s663_s1 + $0x10] sm:$0xff]  ;;  %s671_s12 = smov (!%p186_p4, %s546_s12), 1  ;;  %v556_v2 = vmov 0   ;;  %v203_v9 = vld [vmem:[%s663_s1 + $0x8] sm:$0xff] }
   0xd   : > { %487 = vmatprep.mubr.msk.f32.mxu0 %vm248_vm0, %v202_v0  ;;  %490 = vmatprep.mubr.msk.f32.mxu1 %vm248_vm0, %v204_v1  ;;  %v214_v3 = vld [vmem:[%s664_s2 + $0x10] sm:$0xff]  ;;  %v212_v4 = vld [vmem:[%s664_s2] sm:$0xff]  ;;  %s468_s24 = sshll.u32 %s671_s12, 5  ;;  %v205_v10 = vld [vmem:[%s663_s1 + $0x18] sm:$0xff]  ;;  %s504_s21 = smul.u32 48, %s671_s12  ;;  %vm362_vm1 = vcmask 326656  }
   0xe   : > { %531 = vset.pattern.permute.xlu1 %v556_v2  ;;  %530 = vset.pattern.permute.xlu0 %v556_v2  ;;  %s193_s27 = scalar_lea.vmem %s662_s0, %s468_s24  ;;  %v206_v11 = vld [vmem:[%s663_s1 + $0x20] sm:$0xff]  ;;  %v215_v12 = vld [vmem:[%s664_s2 + $0x18] sm:$0xff]  ;;  %v213_v13 = vld [vmem:[%s664_s2 + $0x8] sm:$0xff] }
   0xf   : > { %230 = vperm.xlu1 %531, %v214_v3   ;;  %220 = vperm.xlu0 %530, %v212_v4   ;;  %v211_v5 = vld [vmem:[%s193_s27 + $0x18] sm:$0xff]  ;;  %v210_v6 = vld [vmem:[%s193_s27 + $0x10] sm:$0xff]  ;;  %v209_v7 = vld [vmem:[%s193_s27 + $0x8] sm:$0xff]  ;;  %s201_s24 = scalar_lea.vmem %s665_s3, %s504_s21 }
  0x10   : > { %479 = vmatprep.subr.mxu0 %v211_v5  ;;  %496 = vmatprep.subr.mxu1 %v211_v5  ;;  %v208_v8 = vld [vmem:[%s193_s27] sm:$0xff]  ;;  %v207_v14 = vld [vmem:[%s663_s1 + $0x28] sm:$0xff] }
  0x11   : > { %480 = vmatpush3.msra.mxu0 %v211_v5  ;;  %500 = vmatpush3.msra.mxu1 %v211_v5  ;;  %v217_v15 = vld [vmem:[%s664_s2 + $0x28] sm:$0xff]  ;;  %v216_v16 = vld [vmem:[%s664_s2 + $0x20] sm:$0xff] }
  0x12   : > { %481 = vmatprep.subr.mxu0 %v210_v6  ;;  %497 = vmatprep.subr.mxu1 %v210_v6 }
  0x13   : > { %482 = vmatpush3.msra.mxu0 %v210_v6  ;;  %501 = vmatpush3.msra.mxu1 %v210_v6 }
  0x14   : > { %483 = vmatprep.subr.mxu0 %v209_v7  ;;  %498 = vmatprep.subr.mxu1 %v209_v7 }
  0x15   : > { %484 = vmatpush3.msra.mxu0 %v209_v7  ;;  %502 = vmatpush3.msra.mxu1 %v209_v7 }
  0x16   : > { %485 = vmatprep.subr.mxu0 %v208_v8  ;;  %499 = vmatprep.subr.mxu1 %v208_v8 }
  0x17   : > { %486 = vmatpush3.msra.mxu0 %v208_v8  ;;  %503 = vmatpush3.msra.mxu1 %v208_v8 }
  0x18   : > { %488 = vmatmul.mubr.msk.f32.vlgmr.msra.gmra.mxu0 %vm248_vm0, %v203_v9  ;;  %491 = vmatmul.mubr.msk.f32.vlgmr.msra.gmra.mxu1 %vm248_vm0, %v205_v10 }
  0x19   : > { %493 = vmatprep.mubr.msk.f32.mxu1 %vm248_vm0, %v206_v11  ;;  %235 = vperm.xlu1 %531, %v215_v12  }
  0x1a   : > { %225 = vperm.xlu0 %530, %v213_v13  }
  0x1c   : > { %494 = vmatmul.mubr.msk.f32.gmra.mxu1 %vm248_vm0, %v207_v14 }
  0x1d   : > { %245 = vperm.xlu1 %531, %v217_v15  }
  0x1e   : > { %240 = vperm.xlu0 %530, %v216_v16  }
  0x8a   : > { %v231_v17 = vpop.permute.xlu1 %230  ;;  %v221_v18 = vpop.permute.xlu0 %220 }
  0x94   : > { %v236_v19 = vpop.permute.xlu1 %235 }
  0x95   : > { %v226_v20 = vpop.permute.xlu0 %225 }
  0x98   : > { %v246_v29 = vpop.permute.xlu1 %245 }
  0x99   : > { %v241_v32 = vpop.permute.xlu0 %240 }
  0xd8   : > { %v489_v21 = vpop.f32.mrf.mxu0  ;;  %v492_v22 = vpop.f32.mrf.mxu1 }
  0xd9   : > { %v339_v23 = vadd.f32 %v489_v21, %v226_v20  ;;  %v349_v24 = vadd.f32 %v492_v22, %v236_v19 }
  0xda   : > { %v333_v25 = vpop.f32.mrf.mxu0  ;;  %v343_v26 = vpop.f32.mrf.mxu1 }
  0xdb   : > { %364 = vst.msk [vmem:[%s201_s24 + $0x8] sm:$0xff] %vm362_vm1, %v339_v23  ;;  %366 = vst.msk [vmem:[%s201_s24 + $0x18] sm:$0xff] %vm362_vm1, %v349_v24  ;;  %v334_v27 = vadd.f32 %v333_v25, %v221_v18  ;;  %v344_v28 = vadd.f32 %v343_v26, %v231_v17 }
  0xdc   : > { %v495_v30 = vpop.f32.mrf.mxu1 }
  0xdd   : > { %363 = vst.msk [vmem:[%s201_s24] sm:$0xff] %vm362_vm1, %v334_v27  ;;  %365 = vst.msk [vmem:[%s201_s24 + $0x10] sm:$0xff] %vm362_vm1, %v344_v28  ;;  %v359_v31 = vadd.f32 %v495_v30, %v246_v29 }
  0xde   : > { %v353_v33 = vpop.f32.mrf.mxu1 }
  0xdf   : > { %368 = vst.msk [vmem:[%s201_s24 + $0x28] sm:$0xff] %vm362_vm1, %v359_v31  ;;  %v354_v34 = vadd.f32 %v353_v33, %v241_v32 }
  0xe1   : > { %367 = vst.msk [vmem:[%s201_s24 + $0x20] sm:$0xff] %vm362_vm1, %v354_v34 }
  0xe2 PF: > { %s13_s14 = sadd.s32 1, %s554_s14   ;;  %s666_s12 = smov %s550_s13 }
  0xe3   : > { %p10_p5 = scmp.ge.s32.totalorder %s13_s14, 4   ;;  %s667_s13 = smov %s669_s15 }
  0xe5   :  { %12 = sbr.rel (!%p10_p5) target bundleno = 2 (0x2), region = 62 }

</bundles_post_ra>
